<compile_context>
chip_gen: v5e
topology: v5e:2x2
jax: 0.10.0
libtpu: 0.0.40
codegen_flags: <defaults>
</compile_context>

<pallas_src>
import functools

import jax
import jax.numpy as jnp
from jax import lax
from jax.experimental import pallas as pl
from jax.experimental.pallas import tpu as pltpu

LANES = 128
SUBLANES = 8


def _sublane_multiple(dtype):
    """Row-tiling multiple implied by the dtype's sublane packing."""
    size = jnp.dtype(dtype).itemsize
    if size >= 4:
        return 8
    if size == 2:
        return 16
    return 32


@functools.lru_cache(maxsize=None)
def _num_tensorcores():
    """Best-effort TensorCores per device (2 on v7x, 1 on v5e/v6e)."""
    try:
        info = pltpu.get_tpu_info()
        for name in ("num_cores", "core_count", "num_tensorcores"):
            v = getattr(info, name, None)
            if isinstance(v, int) and 1 <= v <= 8:
                return v
    except Exception:
        pass
    try:
        dev = jax.devices()[0]
        v = getattr(dev, "num_cores", None)
        if isinstance(v, int) and 1 <= v <= 8:
            return v
        if "v7" in str(getattr(dev, "device_kind", "")).lower():
            return 2
    except Exception:
        pass
    return 1


def _focal_elements(x, t, gamma, alpha):
    """Elementwise focal-loss terms (matches the PyTorch forward)."""
    x = x.astype(jnp.float32)
    t = t.astype(jnp.float32)
    xt = x * t
    om_pt = x + t - 2.0 * xt                 # 1 - pt
    pt = 1.0 - om_pt                         # x*t + (1-x)*(1-t)
    logpt = jnp.log(pt)
    at = alpha + (1.0 - 2.0 * alpha) * t     # (1-a)*t + a*(1-t), folded
    wlog = logpt * at

    g = float(gamma)
    if g == 0.0:
        return -wlog
    if g.is_integer() and 0.0 < g <= 8.0:
        # strength-reduce (1-pt)**g to VPU multiplies (gamma=2 -> one square)
        p = om_pt
        for _ in range(int(g) - 1):
            p = p * om_pt
    else:
        p = om_pt ** g                       # generic non-integer fallback
    return -(p * wlog)


def _focal_loss_kernel(x_ref, t_ref, o_ref, acc_ref, *, gamma, alpha, rows,
                       tile, blocks_per_slice, num_row_blocks, ragged_last,
                       may_revisit):
    c = pl.program_id(0)     # slice axis ("parallel"; split across TCs on v7x)
    k = pl.program_id(1)     # reduction axis ("arbitrary")

    @pl.when(k == 0)
    def _():
        acc_ref[...] = jnp.zeros_like(acc_ref)

    def loss():
        return _focal_elements(x_ref[...], t_ref[...], gamma, alpha)

    def accumulate(v):
        # Whole-(8,128)-tile grouping: lowers to pure vreg adds (no XLU).
        acc_ref[...] += v.reshape(-1, SUBLANES, LANES).sum(axis=0)

    last = num_row_blocks - 1
    bi = c * blocks_per_slice + k            # un-clamped global block index

    if ragged_last:
        valid_rows = rows - last * tile      # static, 0 < valid_rows < tile

        @pl.when(bi < last)                  # full interior blocks: no mask
        def _():
            accumulate(loss())

        @pl.when(bi == last)                 # single ragged block: masked
        def _():
            local_row = lax.broadcasted_iota(jnp.int32, (tile, LANES), 0)
            # Must stay a select (NOT mask*loss): stale rows may hold NaN/Inf.
            accumulate(jnp.where(local_row < valid_rows, loss(), 0.0))
        # bi > last (clamped revisit block): skip compute + accumulate.
    elif may_revisit:
        @pl.when(bi <= last)
        def _():
            accumulate(loss())
    else:
        accumulate(loss())

    @pl.when(k == pl.num_programs(1) - 1)
    def _():
        o_ref[0] = acc_ref[...]


def binary_focal_loss(inp, target, *, gamma=2.0, alpha=0.25,
                      size_average=True, tile_rows=4096):
    """Matches BinaryFocalLoss(gamma, alpha, size_average).forward(inp, target)."""
    xf = inp.reshape(-1)                     # bitcast reshape (no copy)
    tf = target.reshape(-1)
    # target.float() semantics applied in-kernel (VMEM cast); keep narrow
    # dtypes narrow in HBM.  Only bool is widened (to int8, 1 byte/elem).
    if xf.dtype == jnp.bool_:
        xf = xf.astype(jnp.int8)
    if tf.dtype == jnp.bool_:
        tf = tf.astype(jnp.int8)

    n = xf.shape[0]
    row_align = max(_sublane_multiple(xf.dtype), _sublane_multiple(tf.dtype))
    elem_align = row_align * LANES
    n_main = (n // elem_align) * elem_align  # aligned prefix for the kernel
    rows = n_main // LANES

    total = jnp.zeros((), jnp.float32)

    if rows > 0:
        if n_main == n:
            xm, tm = xf, tf
        else:
            xm = lax.slice(xf, (0,), (n_main,))
            tm = lax.slice(tf, (0,), (n_main,))
        x2 = xm.reshape(rows, LANES)
        t2 = tm.reshape(rows, LANES)

        tile_cap = max(row_align, (int(tile_rows) // row_align) * row_align)
        tile = min(rows, tile_cap)           # both multiples of row_align

        num_row_blocks = pl.cdiv(rows, tile)
        num_slices = 2 if (num_row_blocks >= 2 and _num_tensorcores() >= 2) else 1
        blocks_per_slice = pl.cdiv(num_row_blocks, num_slices)

        ragged_last = (num_row_blocks * tile != rows)
        may_revisit = (num_slices * blocks_per_slice != num_row_blocks)

        if may_revisit:
            def in_index(c, k):
                # Clamp: extra iterations of the short slice re-read a valid
                # block; the kernel skips them entirely (no accumulate).
                return (jnp.minimum(c * blocks_per_slice + k,
                                    num_row_blocks - 1), 0)
        else:
            def in_index(c, k):
                return (c * blocks_per_slice + k, 0)

        kernel = functools.partial(
            _focal_loss_kernel, gamma=float(gamma), alpha=float(alpha),
            rows=rows, tile=tile, blocks_per_slice=blocks_per_slice,
            num_row_blocks=num_row_blocks, ragged_last=ragged_last,
            may_revisit=may_revisit)

        # Double-buffered input blocks + outputs + accumulator.
        block_bytes = tile * LANES * (x2.dtype.itemsize + t2.dtype.itemsize)
        vmem_need = 2 * block_bytes + (2 * num_slices + 1) * SUBLANES * LANES * 4
        cp_kwargs = dict(dimension_semantics=("parallel", "arbitrary"))
        if vmem_need > 12 * 1024 * 1024:
            # Very large user-requested tiles: raise the scoped-VMEM cap
            # (v5e default is only ~16 MiB).
            cp_kwargs["vmem_limit_bytes"] = int(vmem_need * 3 // 2)

        partials = pl.pallas_call(
            kernel,
            out_shape=jax.ShapeDtypeStruct((num_slices, SUBLANES, LANES),
                                           jnp.float32),
            grid_spec=pltpu.PrefetchScalarGridSpec(
                num_scalar_prefetch=0,
                grid=(num_slices, blocks_per_slice),
                in_specs=[
                    pl.BlockSpec((tile, LANES), in_index),
                    pl.BlockSpec((tile, LANES), in_index),
                ],
                out_specs=pl.BlockSpec((1, SUBLANES, LANES),
                                       lambda c, k: (c, 0, 0)),
                scratch_shapes=[pltpu.VMEM((SUBLANES, LANES), jnp.float32)],
            ),
            compiler_params=pltpu.CompilerParams(**cp_kwargs),
        )(x2, t2)
        total = total + jnp.sum(partials)    # tiny cross-lane reduce in XLA

    if n_main != n:
        # Ragged tail (< row_align*128 elements): trivial XLA reduction,
        # avoids any full-array pad/copy of the inputs.
        xt = lax.slice(xf, (n_main,), (n,))
        tt = lax.slice(tf, (n_main,), (n,))
        total = total + jnp.sum(_focal_elements(xt, tt, gamma, alpha))

    return total / n if size_average else total


def binary_focal_loss_ref(inp, target, *, gamma=2.0, alpha=0.25,
                          size_average=True):
    x = inp.reshape(-1).astype(jnp.float32)
    t = target.reshape(-1).astype(jnp.float32)
    pt = x * t + (1.0 - x) * (1.0 - t)
    logpt = jnp.log(pt)
    at = (1.0 - alpha) * t + alpha * (1.0 - t)
    loss = -((1.0 - pt) ** gamma) * (logpt * at)
    return loss.mean() if size_average else loss.sum()


if __name__ == "__main__":
    key = jax.random.PRNGKey(0)

    def make_inputs(shape, k, target_dtype=jnp.float32):
        k1, k2 = jax.random.split(k)
        x = jax.nn.sigmoid(jax.random.normal(k1, shape, jnp.float32))
        y = jax.random.bernoulli(k2, 0.5, shape).astype(target_dtype)
        return x, y

    cases = [
        # canonical module usage (gamma=2, alpha=0.25, mean)
        ((2, 4, 16, 16), jnp.float32,
         dict(gamma=2.0, alpha=0.25, size_average=True)),
        # larger single-block path with default big tiles
        ((2, 8, 128, 128), jnp.float32,
         dict(gamma=2.0, alpha=0.25, size_average=True)),
        # multi-block + ragged last block (+ clamped revisit on 2-TC chips),
        # sum reduction, gamma=3
        ((4, 5, 32, 32), jnp.float32,
         dict(gamma=3.0, alpha=0.25, size_average=False, tile_rows=64)),
        # non-lane-aligned element count -> XLA tail path, gamma=0
        ((3, 3, 17, 19), jnp.float32,
         dict(gamma=0.0, alpha=0.4, size_average=True)),
        # native int8 target streamed without an f32 HBM copy
        ((2, 8, 64, 64), jnp.int8,
         dict(gamma=2.0, alpha=0.25, size_average=True)),
    ]

    keys = jax.random.split(key, len(cases))
    for (shape, tdt, kw), k in zip(cases, keys):
        x, y = make_inputs(shape, k, tdt)
        got = jax.block_until_ready(binary_focal_loss(x, y, **kw))
        ref_kw = {kk: v for kk, v in kw.items() if kk != "tile_rows"}
        want = binary_focal_loss_ref(x, y, **ref_kw)
        assert jnp.allclose(got, want, rtol=1e-5, atol=1e-6), \
            (shape, kw, got, want)

    print("KERNEL_OK")
</pallas_src>

<mosaic_0001>
module attributes {stable_mosaic.version = 11 : i64} {
  func.func @_focal_loss_kernel(%arg0: i32, %arg1: i32, %arg2: memref<16x128xf32, #tpu.memory_space<vmem>>, %arg3: memref<16x128xf32, #tpu.memory_space<vmem>>, %arg4: memref<1x8x128xf32, #tpu.memory_space<vmem>>, %arg5: memref<8x128xf32, #tpu.memory_space<vmem>>) attributes {dimension_semantics = [#tpu.dimension_semantics<parallel>, #tpu.dimension_semantics<arbitrary>], iteration_bounds = array<i64: 1, 1>, scalar_prefetch = 0 : i64, scratch_operands = 1 : i64, tpu.core_type = #tpu.core_type<tc>, window_params = [{transform_indices = @transform_0, window_bounds = array<i64: 16, 128>}, {transform_indices = @transform_1, window_bounds = array<i64: 16, 128>}, {transform_indices = @transform_2, window_bounds = array<i64: 1, 8, 128>}]} {
    %c0_i32 = arith.constant 0 : i32
    %0 = arith.cmpi eq, %arg1, %c0_i32 : i32
    %1 = arith.extui %0 : i1 to i32
    %c0_i32_0 = arith.constant 0 : i32
    %2 = arith.cmpi ne, %1, %c0_i32_0 : i32
    scf.if %2 {
      %cst_15 = arith.constant 0.000000e+00 : f32
      %30 = vector.broadcast %cst_15 : f32 to vector<8x128xf32>
      %c0_16 = arith.constant 0 : index
      %c0_17 = arith.constant 0 : index
      %31 = vector.load %arg5[%c0_16, %c0_17] : memref<8x128xf32, #tpu.memory_space<vmem>>, vector<8x128xf32>
      tpu.vector_store %arg5[%c0_16, %c0_17], %30 {strides = array<i32>} : memref<8x128xf32, #tpu.memory_space<vmem>>, vector<8x128xf32>,
    } else {
    }
    %c0 = arith.constant 0 : index
    %c0_1 = arith.constant 0 : index
    %3 = vector.load %arg2[%c0, %c0_1] : memref<16x128xf32, #tpu.memory_space<vmem>>, vector<16x128xf32>
    %c0_2 = arith.constant 0 : index
    %c0_3 = arith.constant 0 : index
    %4 = vector.load %arg3[%c0_2, %c0_3] : memref<16x128xf32, #tpu.memory_space<vmem>>, vector<16x128xf32>
    %5 = arith.mulf %3, %4 : vector<16x128xf32>
    %6 = arith.addf %3, %4 : vector<16x128xf32>
    %cst = arith.constant 2.000000e+00 : f32
    %7 = vector.broadcast %cst : f32 to vector<16x128xf32>
    %8 = arith.mulf %7, %5 : vector<16x128xf32>
    %9 = arith.subf %6, %8 : vector<16x128xf32>
    %cst_4 = arith.constant 1.000000e+00 : f32
    %10 = vector.broadcast %cst_4 : f32 to vector<16x128xf32>
    %11 = arith.subf %10, %9 : vector<16x128xf32>
    %12 = math.log %11 : vector<16x128xf32>
    %cst_5 = arith.constant 5.000000e-01 : f32
    %13 = vector.broadcast %cst_5 : f32 to vector<16x128xf32>
    %14 = arith.mulf %13, %4 : vector<16x128xf32>
    %cst_6 = arith.constant 2.500000e-01 : f32
    %15 = vector.broadcast %cst_6 : f32 to vector<16x128xf32>
    %16 = arith.addf %15, %14 : vector<16x128xf32>
    %17 = arith.mulf %12, %16 : vector<16x128xf32>
    %18 = arith.mulf %9, %9 : vector<16x128xf32>
    %19 = arith.mulf %18, %17 : vector<16x128xf32>
    %cst_7 = arith.constant 0.000000e+00 : f32
    %20 = vector.broadcast %cst_7 : f32 to vector<16x128xf32>
    %21 = arith.subf %20, %19 : vector<16x128xf32>
    %c0_8 = arith.constant 0 : index
    %c0_9 = arith.constant 0 : index
    %22 = vector.load %arg5[%c0_8, %c0_9] : memref<8x128xf32, #tpu.memory_space<vmem>>, vector<8x128xf32>
    %23 = vector.shape_cast %21 : vector<16x128xf32> to vector<2x8x128xf32>
    %cst_10 = arith.constant dense<0.000000e+00> : vector<8x128xf32>
    %24 = vector.multi_reduction <add>, %23, %cst_10 [0] : vector<2x8x128xf32> to vector<8x128xf32>
    %25 = arith.addf %22, %24 : vector<8x128xf32>
    %c0_11 = arith.constant 0 : index
    %c0_12 = arith.constant 0 : index
    %26 = vector.load %arg5[%c0_11, %c0_12] : memref<8x128xf32, #tpu.memory_space<vmem>>, vector<8x128xf32>
    tpu.vector_store %arg5[%c0_11, %c0_12], %25 {strides = array<i32>} : memref<8x128xf32, #tpu.memory_space<vmem>>, vector<8x128xf32>,
    %c0_i32_13 = arith.constant 0 : i32
    %27 = arith.cmpi eq, %arg1, %c0_i32_13 : i32
    %28 = arith.extui %27 : i1 to i32
    %c0_i32_14 = arith.constant 0 : i32
    %29 = arith.cmpi ne, %28, %c0_i32_14 : i32
    scf.if %29 {
      %c0_15 = arith.constant 0 : index
      %c0_16 = arith.constant 0 : index
      %30 = vector.load %arg5[%c0_15, %c0_16] : memref<8x128xf32, #tpu.memory_space<vmem>>, vector<8x128xf32>
      %c0_17 = arith.constant 0 : index
      %c0_18 = arith.constant 0 : index
      %c0_19 = arith.constant 0 : index
      %31 = vector.load %arg4[%c0_17, %c0_18, %c0_19] : memref<1x8x128xf32, #tpu.memory_space<vmem>>, vector<1x8x128xf32>
      %32 = vector.shape_cast %31 : vector<1x8x128xf32> to vector<8x128xf32>
      %33 = vector.shape_cast %30 : vector<8x128xf32> to vector<1x8x128xf32>
      tpu.vector_store %arg4[%c0_17, %c0_18, %c0_19], %33 {strides = array<i32>} : memref<1x8x128xf32, #tpu.memory_space<vmem>>, vector<1x8x128xf32>,
    } else {
    }
    return
  }
  func.func @transform_0(%arg0: i32, %arg1: i32) -> (i32, i32) {
    %c1_i32 = arith.constant 1 : i32
    %0 = arith.muli %arg0, %c1_i32 : i32
    %1 = arith.addi %0, %arg1 : i32
    %c0_i32 = arith.constant 0 : i32
    %c0_i32_0 = arith.constant 0 : i32
    return %1, %c0_i32 : i32, i32
  }
  func.func @transform_1(%arg0: i32, %arg1: i32) -> (i32, i32) {
    %c1_i32 = arith.constant 1 : i32
    %0 = arith.muli %arg0, %c1_i32 : i32
    %1 = arith.addi %0, %arg1 : i32
    %c0_i32 = arith.constant 0 : i32
    %c0_i32_0 = arith.constant 0 : i32
    return %1, %c0_i32 : i32, i32
  }
  func.func @transform_2(%arg0: i32, %arg1: i32) -> (i32, i32, i32) {
    %c0_i32 = arith.constant 0 : i32
    %c0_i32_0 = arith.constant 0 : i32
    %c0_i32_1 = arith.constant 0 : i32
    return %arg0, %c0_i32, %c0_i32_0 : i32, i32, i32
  }
}

</mosaic_0001>

<bundles_post_ra>
// kernel: tpu_custom_call.1
= control target key start
LH: loop header
LB: loop body
LE: loop exit
PB: predicated region body
PF: predicated region fallthrough
CT: control target
= control target key end

     0   :  { %7 = vsyncpa [#allocation4], 0  ;;  %s234_s0 = inlined_call_operand.hbm [shape: f32[16,128], index: 0, kind: input, shape index: {}]   ;;  %s235_s1 = inlined_call_operand.hbm [shape: f32[16,128], index: 1, kind: input, shape index: {}]   ;;  %s236_s2 = inlined_call_operand.hbm [shape: f32[1,8,128], index: 2, kind: output, shape index: {}]  }
   0x1   :  { %8 = vsyncpa [#allocation7], 0 }
   0x2   :  { %9 = vsyncpa [#allocation5], 0  ;;  %s18_s11 = sshll.u32 %s234_s0, 4  ;;  %s205_s12 = smov [#allocation3]   ;;  %s19_s11 = int_to_ptr.hbm [resolvable:$true] %s18_s11 }
   0x3   :  { %s20_s13 = sshll.u32 %s205_s12, 4  ;;  %s35_s16 = sshll.u32 %s235_s1, 4  ;;  %s21_s13 = int_to_ptr.vmem [resolvable:$true] %s20_s13  ;;  %s36_s16 = int_to_ptr.hbm [resolvable:$true] %s35_s16 }
   0x4   :  { %s206_s17 = smov 128   ;;  %s207_s18 = smov 8  }
   0x5   :  { %26 = dma.hbm_to_vmem [thread:$0]  %s19_s11, 256, %s21_s13, [#allocation4], %s206_s17, %s206_s17, %s207_s18  }
   0x6   :  { %s208_s19 = smov [#allocation6]  }
   0x7   :  { %s37_s20 = sshll.u32 %s208_s19, 4  ;;  %s38_s20 = int_to_ptr.vmem [resolvable:$true] %s37_s20 }
   0x8   :  { %43 = dma.hbm_to_vmem [thread:$0]  %s36_s16, 256, %s38_s20, [#allocation7], %s206_s17, %s206_s17, %s207_s18  }
   0x9   :  { %199 = dma.done.wait [#allocation4], 256  }
   0xa   :  { %200 = vsyncadd [#allocation4], 4294967040 }
   0xb   :  { %201 = dma.done.wait [#allocation7], 256  }
   0xc   :  { %202 = vsyncadd [#allocation7], 4294967040  ;;  %v61_v0 = vld [vmem:[#allocation3] sm:$0xff]  ;;  %v62_v1 = vld [vmem:[#allocation3 + $0x8] sm:$0xff]  ;;  %s209_s0 = smov [#allocation8]   ;;  %s107_s23 = sshll.u32 %s236_s2, 4  ;;  %s108_s23 = int_to_ptr.hbm [resolvable:$true] %s107_s23 }
   0xd   :  { %v63_v2 = vld [vmem:[#allocation6] sm:$0xff]  ;;  %v64_v3 = vld [vmem:[#allocation6 + $0x8] sm:$0xff]  ;;  %s105_s1 = sshll.u32 %s209_s0, 4  ;;  %s106_s1 = int_to_ptr.vmem [resolvable:$true] %s105_s1 }
   0xe   :  { %v65_v4 = vmul.f32 %v63_v2, %v61_v0  ;;  %v67_v5 = vadd.f32 %v63_v2, %v61_v0  ;;  %v66_v6 = vmul.f32 %v64_v3, %v62_v1  ;;  %v68_v7 = vadd.f32 %v64_v3, %v62_v1 }
   0xf   :  { %v79_v14 = vmul.f32 0.5, %v63_v2  ;;  %v80_v15 = vmul.f32 0.5, %v64_v3 }
  0x10   :  { %v69_v8 = vmul.f32 2.0, %v65_v4  ;;  %v70_v9 = vmul.f32 2.0, %v66_v6 }
  0x11   :  { %v81_v16 = vadd.f32 0.25, %v79_v14  ;;  %v82_v18 = vadd.f32 0.25, %v80_v15 }
  0x12   :  { %v71_v10 = vsub.f32 %v67_v5, %v69_v8  ;;  %v72_v11 = vsub.f32 %v68_v7, %v70_v9 }
  0x14   :  { %v73_v12 = vsub.f32 1.0, %v71_v10  ;;  %v74_v13 = vsub.f32 1.0, %v72_v11  ;;  %v85_v21 = vmul.f32 %v71_v10, %v71_v10  ;;  %v86_v23 = vmul.f32 %v72_v11, %v72_v11 }
  0x16   :  { %123 = vlog2.f32 %v73_v12 }
  0x17   :  { %125 = vlog2.f32 %v74_v13 }
  0x1c   :  { %v124_v17 = vpop.eup %123 }
  0x1d   :  { %v126_v19 = vpop.eup %125  ;;  %v76_v20 = vmul.f32 0.6931472, %v124_v17 }
  0x1e   :  { %v78_v22 = vmul.f32 0.6931472, %v126_v19 }
  0x1f   :  { %v83_v24 = vmul.f32 %v81_v16, %v76_v20 }
  0x20   :  { %v84_v25 = vmul.f32 %v82_v18, %v78_v22 }
  0x21   :  { %v87_v26 = vmul.f32 %v85_v21, %v83_v24 }
  0x22   :  { %v88_v27 = vmul.f32 %v86_v23, %v84_v25 }
  0x23   :  { %v89_v28 = vsub.f32 0.0, %v87_v26 }
  0x24   :  { %v90_v29 = vsub.f32 0.0, %v88_v27 }
  0x26   :  { %v92_v30 = vadd.f32 %v90_v29, %v89_v28 }
  0x28   :  { %99 = vst [vmem:[#allocation8] sm:$0xff] %v92_v30 }
  0x29   :  { %110 = dma.vmem_to_hbm [thread:$0]  %s106_s1, 128, %s108_s23, [#allocation5]  }
  0x2a   :  { %203 = dma.done.wait [#allocation5], 128  }
  0x2b   :  { %204 = vsyncadd [#allocation5], 4294967168 }
  0x2c   :  { %115 = vsyncpa [#allocation4], 1 }
  0x2d   :  { %116 = vsyncpa [#allocation7], 1 }
  0x2e   :  { %117 = vsyncpa [#allocation5], 1 }

</bundles_post_ra>
